<compile_context>
chip_gen: v6e
topology: v6e:2x2x1
jax: 0.10.0
libtpu: 0.0.40
codegen_flags: <defaults>
</compile_context>

<pallas_src>
import functools

import jax
import jax.numpy as jnp
from jax import lax
from jax.experimental import pallas as pl
from jax.experimental.pallas import tpu as pltpu


def _transpose_kernel(x_ref, o_ref):
    # x_ref: (C, tn) channel-major slab; o_ref: (tn, C) token-major.
    # Single XLU transpose per tile; lane-dense stores whenever C % 128 == 0.
    o_ref[...] = x_ref[...].T


def _transpose_norm_kernel(eps, x_ref, g_ref, b_ref, o_ref):
    # Fused flatten/transpose + LayerNorm over the embedding dim C.
    # Stats are computed in the channel-major (C, tn) layout, reducing over the
    # sublane axis (axis 0); normalization also happens channel-major so only
    # one XLU transpose is needed. gamma/beta are applied lane-aligned after
    # the transpose as (1, C) row vectors.
    x = x_ref[...].astype(jnp.float32)                    # (C, tn), f32 math
    inv_c = 1.0 / x.shape[0]
    mean = jnp.sum(x, axis=0, keepdims=True) * inv_c      # (1, tn) sublane reduce
    xc = x - mean
    var = jnp.sum(xc * xc, axis=0, keepdims=True) * inv_c # biased var (PyTorch LN)
    inv = lax.rsqrt(var + eps)                            # EUP slot
    xn = xc * inv                                         # still (C, tn)
    y = xn.T                                              # single XLU transpose -> (tn, C)
    y = y * g_ref[...].astype(jnp.float32) + b_ref[...].astype(jnp.float32)
    o_ref[...] = y.astype(o_ref.dtype)


def _chip_profile():
    """Generation-aware VMEM budget / parallelism hints (trace-time query)."""
    vmem = None
    try:
        info = pltpu.get_tpu_info()
        v = int(getattr(info, "vmem_capacity_bytes", 0) or 0)
        vmem = v if v > 0 else None
    except Exception:
        vmem = None
    if vmem is None:
        vmem = 64 << 20  # conservative default (v7x per-TC size)
    if vmem <= (96 << 20):
        # v7x-class: 64 MiB VMEM per TC, 2 TensorCores share HBM.
        return {"vmem_cap": 44 << 20, "budget": 36 << 20, "multi_core": True}
    # v5e / v6e-class: 128 MiB VMEM, single TensorCore.
    return {"vmem_cap": 64 << 20, "budget": 48 << 20, "multi_core": False}


def patch_embed_pallas(x, gamma=None, beta=None, *, eps=1e-5, max_tn=2048):
    """PatchEmbed forward.

    x: (B, C, H, W) -> (B, H*W, C). If gamma/beta (shape (C,)) are given, a
    LayerNorm over the embedding dim is fused (PyTorch nn.LayerNorm semantics).
    """
    assert (gamma is None) == (beta is None), "gamma and beta must be given together"
    B, C, H, W = x.shape
    N = H * W
    x3 = x.reshape(B, C, N)                   # row-major flatten(2) is free

    fused_ln = gamma is not None
    elt = x.dtype.itemsize
    prof = _chip_profile()

    def footprint(t):
        # double-buffered in (C,t) + out (t,C) blocks, plus in-kernel temporaries
        blocks = 4 * C * t * elt
        temps = (4 * C * t * 4) if fused_ln else (C * t * elt)
        return blocks + temps

    # Token tile: as large as the generation's VMEM budget allows. Either
    # covers all of N, or is a multiple of 128 (lane-aligned) with a cdiv grid
    # for the tail. Floor the halving so strided input-DMA rows stay >= 2 KB.
    assert max_tn % 256 == 0
    tn_floor = 512 if elt >= 4 else 1024
    tn = N if N <= max_tn else max_tn
    while tn > tn_floor and tn % 256 == 0 and footprint(tn) > prof["budget"]:
        tn //= 2

    # v7x megacore: keep at least 2 parallel grid iterations so both
    # TensorCores have work (only matters when B == 1 and tn swallowed N).
    if prof["multi_core"] and N > 128:
        iters = B * ((N + tn - 1) // tn)
        if iters < 2:
            half = ((((N + 1) // 2) + 127) // 128) * 128
            tn = min(tn, max(128, half))

    grid = (B, pl.cdiv(N, tn))

    # Explicit VMEM limit: blocks + LN f32 temporaries + headroom, clamped per
    # generation (v5e/v6e have 128 MiB physical, v7x 64 MiB per TC).
    temps = (4 * C * tn * 4) if fused_ln else (C * tn * elt)
    vmem_limit = 4 * C * tn * elt + temps + (2 << 20)
    vmem_limit = int(min(max(vmem_limit, 16 << 20), prof["vmem_cap"]))

    compiler_params = pltpu.CompilerParams(
        dimension_semantics=("parallel", "parallel"),
        vmem_limit_bytes=vmem_limit,
    )

    io_bytes = 2 * B * N * C * elt
    out_shape = jax.ShapeDtypeStruct((B, N, C), x.dtype)

    x_spec = pl.BlockSpec((None, C, tn), lambda b, j: (b, 0, j))
    o_spec = pl.BlockSpec((None, tn, C), lambda b, j: (b, j, 0))

    if not fused_ln:
        cost = pl.CostEstimate(flops=0, transcendentals=0, bytes_accessed=io_bytes)
        return pl.pallas_call(
            _transpose_kernel,
            out_shape=out_shape,
            grid_spec=pltpu.PrefetchScalarGridSpec(
                num_scalar_prefetch=0,
                grid=grid,
                in_specs=[x_spec],
                out_specs=o_spec,
            ),
            compiler_params=compiler_params,
            cost_estimate=cost,
        )(x3)

    g2 = gamma.reshape(1, C)
    b2 = beta.reshape(1, C)
    cost = pl.CostEstimate(
        flops=7 * B * N * C, transcendentals=B * N, bytes_accessed=io_bytes + 2 * C * 4
    )
    param_spec = pl.BlockSpec((1, C), lambda b, j: (0, 0))
    return pl.pallas_call(
        functools.partial(_transpose_norm_kernel, float(eps)),
        out_shape=out_shape,
        grid_spec=pltpu.PrefetchScalarGridSpec(
            num_scalar_prefetch=0,
            grid=grid,
            in_specs=[x_spec, param_spec, param_spec],
            out_specs=o_spec,
        ),
        compiler_params=compiler_params,
        cost_estimate=cost,
    )(x3, g2, b2)


def patch_embed_reference(x, gamma=None, beta=None, eps=1e-5):
    B, C, H, W = x.shape
    y = jnp.transpose(x.reshape(B, C, H * W), (0, 2, 1))
    if gamma is not None:
        mean = jnp.mean(y, axis=-1, keepdims=True)
        var = jnp.mean((y - mean) ** 2, axis=-1, keepdims=True)
        y = (y - mean) / jnp.sqrt(var + eps) * gamma + beta
    return y


if __name__ == "__main__":
    key = jax.random.PRNGKey(0)
    k1, k2, kg, kb = jax.random.split(key, 4)

    # Case 1: module defaults (embed_dim=50, norm_layer=None) -> pure
    # flatten(2).transpose(1, 2).
    B, C, H, W = 2, 50, 16, 16
    x = jax.random.normal(k1, (B, C, H, W), dtype=jnp.float32)
    out = jax.block_until_ready(patch_embed_pallas(x))
    ref = patch_embed_reference(x)
    assert out.shape == (B, H * W, C)
    assert jnp.allclose(out, ref), "PatchEmbed (no norm) mismatch vs reference"

    # Case 2: lane-dense embed_dim (multiple of 128) with LayerNorm fused
    # (norm_layer=nn.LayerNorm path of the module).
    B2, C2, H2, W2 = 2, 128, 16, 16
    x2 = jax.random.normal(k2, (B2, C2, H2, W2), dtype=jnp.float32)
    gamma = 1.0 + 0.1 * jax.random.normal(kg, (C2,), dtype=jnp.float32)
    beta = 0.1 * jax.random.normal(kb, (C2,), dtype=jnp.float32)
    out2 = jax.block_until_ready(patch_embed_pallas(x2, gamma, beta))
    ref2 = patch_embed_reference(x2, gamma, beta)
    assert out2.shape == (B2, H2 * W2, C2)
    assert jnp.allclose(out2, ref2, atol=1e-5, rtol=1e-5), "PatchEmbed (LayerNorm) mismatch"

    print("KERNEL_OK")
</pallas_src>

<mosaic_0001>
module attributes {stable_mosaic.version = 11 : i64} {
  func.func @_transpose_kernel(%arg0: i32, %arg1: i32, %arg2: memref<1x50x256xf32, #tpu.memory_space<vmem>>, %arg3: memref<1x256x50xf32, #tpu.memory_space<vmem>>) attributes {dimension_semantics = [#tpu.dimension_semantics<parallel>, #tpu.dimension_semantics<parallel>], iteration_bounds = array<i64: 2, 1>, scalar_prefetch = 0 : i64, scratch_operands = 0 : i64, tpu.core_type = #tpu.core_type<tc>, window_params = [{transform_indices = @transform_0, window_bounds = array<i64: 1, 50, 256>}, {transform_indices = @transform_1, window_bounds = array<i64: 1, 256, 50>}]} {
    %c0 = arith.constant 0 : index
    %c0_0 = arith.constant 0 : index
    %c0_1 = arith.constant 0 : index
    %0 = vector.load %arg2[%c0, %c0_0, %c0_1] : memref<1x50x256xf32, #tpu.memory_space<vmem>>, vector<1x50x256xf32>
    %1 = vector.shape_cast %0 : vector<1x50x256xf32> to vector<50x256xf32>
    %2 = tpu.transpose %1, [1, 0] : vector<50x256xf32> -> vector<256x50xf32>
    %c0_2 = arith.constant 0 : index
    %c0_3 = arith.constant 0 : index
    %c0_4 = arith.constant 0 : index
    %3 = vector.load %arg3[%c0_2, %c0_3, %c0_4] : memref<1x256x50xf32, #tpu.memory_space<vmem>>, vector<1x256x50xf32>
    %4 = vector.shape_cast %3 : vector<1x256x50xf32> to vector<256x50xf32>
    %5 = vector.shape_cast %2 : vector<256x50xf32> to vector<1x256x50xf32>
    tpu.vector_store %arg3[%c0_2, %c0_3, %c0_4], %5 {strides = array<i32>} : memref<1x256x50xf32, #tpu.memory_space<vmem>>, vector<1x256x50xf32>,
    return
  }
  func.func @transform_0(%arg0: i32, %arg1: i32) -> (i32, i32, i32) {
    %c0_i32 = arith.constant 0 : i32
    %c0_i32_0 = arith.constant 0 : i32
    return %arg0, %c0_i32, %arg1 : i32, i32, i32
  }
  func.func @transform_1(%arg0: i32, %arg1: i32) -> (i32, i32, i32) {
    %c0_i32 = arith.constant 0 : i32
    %c0_i32_0 = arith.constant 0 : i32
    return %arg0, %arg1, %c0_i32 : i32, i32, i32
  }
}

</mosaic_0001>

<bundles_post_ra>
// kernel: tpu_custom_call.1
= control target key start
LH: loop header
LB: loop body
LE: loop exit
PB: predicated region body
PF: predicated region fallthrough
CT: control target
= control target key end

     0   :  { %s425_s6 = smov 0   ;;  %s427_s7 = smov 0   ;;  %s528_s0 = inlined_call_operand.vmem [shape: f32[2,50,256], index: 0, kind: input, shape index: {}]   ;;  %s529_s1 = inlined_call_operand.vmem [shape: f32[2,256,50], index: 1, kind: output, shape index: {}]  }
   0x1   :  { %s429_s8 = smov 0  }
   0x2 LB: > { %s23_s9 = sadd.s32 1, %s409_s7  ;;  %p358_p0 = scmp.ge.s32.totalorder %s413_s8, 1  ;;  %s413_s8 = sphi %s429_s8, %s11_s8   ;;  %s409_s7 = sphi %s427_s7, %s531_s7   ;;  %s405_s6 = sphi %s425_s6, %s530_s6  }
   0x3   : > { %p25_p1 = scmp.ge.s32.totalorder %s23_s9, 2  ;;  %p108_p2 = scmp.lt.s32.totalorder %s413_s8, 3 }
   0x5   : > { %s533_s9 = smov (%p25_p1, %s23_s9), 0  ;;  %p109_p3 = pnand %p358_p0, %p108_p2 }
   0x6   : > { %p137_p4 = scmp.lt.s32.totalorder (!%p109_p3), %s405_s6, 1 }
   0x7   : > { %112 = sbr.rel (%p109_p3) target bundleno = 203 (0xcb), region = 24 }
   0xc   : > { %s535_s6 = smov (!%p137_p4, %s405_s6), 1  ;;  %vm234_vm0 = vcmask 408576  }
   0xd   : > { %s365_s10 = smul.u32 112, %s535_s6  ;;  %s364_s14 = sshll.u32 %s535_s6, 8 }
   0xe   : > { %s453_s17 = scalar_lea.vmem %s529_s1, %s364_s14 }
   0xf   : > { %s144_s13 = scalar_lea.vmem %s528_s0, %s365_s10 }
  0x10   : > { %v157_v0 = vld [vmem:[%s144_s13 + $0x8] sm:$0xff]  ;;  %v156_v1 = vld [vmem:[%s144_s13] sm:$0xff]  ;;  %v159_v2 = vld [vmem:[%s144_s13 + $0x18] sm:$0xff] }
  0x11   : > { %202 = vxpose.xlu1.b32.start [1/7] (short) %v157_v0, 128  ;;  %170 = vxpose.xlu0.b32.start [1/7] (short) %v156_v1, 128  ;;  %v158_v3 = vld [vmem:[%s144_s13 + $0x10] sm:$0xff]  ;;  %v161_v4 = vld [vmem:[%s144_s13 + $0x28] sm:$0xff]  ;;  %v160_v5 = vld [vmem:[%s144_s13 + $0x20] sm:$0xff] }
  0x12   : > { %v163_v6 = vld [vmem:[%s144_s13 + $0x38] sm:$0xff]  ;;  %v162_v7 = vld [vmem:[%s144_s13 + $0x30] sm:$0xff]  ;;  %v165_v8 = vld [vmem:[%s144_s13 + $0x48] sm:$0xff] }
  0x13   : > { %v164_v9 = vld [vmem:[%s144_s13 + $0x40] sm:$0xff]  ;;  %v167_v10 = vld [vmem:[%s144_s13 + $0x58] sm:$0xff]  ;;  %v166_v11 = vld [vmem:[%s144_s13 + $0x50] sm:$0xff] }
  0x14   : > { %v169_v12 = vld [vmem:[%s144_s13 + $0x68] sm:$0x3]  ;;  %v168_v13 = vld [vmem:[%s144_s13 + $0x60] sm:$0x3] }
  0x15   : > { %203 = vxpose.xlu1.b32.cont [2/7] (short) %v159_v2, 128  ;;  %171 = vxpose.xlu0.b32.cont [2/7] (short) %v158_v3, 128 }
  0x19   : > { %204 = vxpose.xlu1.b32.cont [3/7] (short) %v161_v4, 128  ;;  %172 = vxpose.xlu0.b32.cont [3/7] (short) %v160_v5, 128 }
  0x1d   : > { %205 = vxpose.xlu1.b32.cont [4/7] (short) %v163_v6, 128  ;;  %173 = vxpose.xlu0.b32.cont [4/7] (short) %v162_v7, 128 }
  0x21   : > { %206 = vxpose.xlu1.b32.cont [5/7] (short) %v165_v8, 128  ;;  %174 = vxpose.xlu0.b32.cont [5/7] (short) %v164_v9, 128 }
  0x25   : > { %207 = vxpose.xlu1.b32.cont [6/7] (short) %v167_v10, 128  ;;  %175 = vxpose.xlu0.b32.cont [6/7] (short) %v166_v11, 128 }
  0x29   : > { %208 = vxpose.xlu1.b32.end [7/7] (short) %v169_v12, 128  ;;  %176 = vxpose.xlu0.b32.end [7/7] (short) %v168_v13, 128 }
  0x8d   : > { %v218_v14 = vpop.trf.xlu1  ;;  %v186_v15 = vpop.trf.xlu0 }
  0x8e   : > { %251 = vst.msk [vmem:[%s453_s17 + $0x80] sm:$0xff] %vm234_vm0, %v218_v14  ;;  %235 = vst.msk [vmem:[%s453_s17] sm:$0xff] %vm234_vm0, %v186_v15 }
  0x91   : > { %v219_v16 = vpop.trf.xlu1  ;;  %v187_v17 = vpop.trf.xlu0 }
  0x92   : > { %252 = vst.msk [vmem:[%s453_s17 + $0x88] sm:$0xff] %vm234_vm0, %v219_v16  ;;  %236 = vst.msk [vmem:[%s453_s17 + $0x8] sm:$0xff] %vm234_vm0, %v187_v17 }
  0x95   : > { %v220_v18 = vpop.trf.xlu1  ;;  %v188_v19 = vpop.trf.xlu0 }
  0x96   : > { %253 = vst.msk [vmem:[%s453_s17 + $0x90] sm:$0xff] %vm234_vm0, %v220_v18  ;;  %237 = vst.msk [vmem:[%s453_s17 + $0x10] sm:$0xff] %vm234_vm0, %v188_v19 }
  0x99   : > { %v221_v20 = vpop.trf.xlu1  ;;  %v189_v21 = vpop.trf.xlu0 }
  0x9a   : > { %254 = vst.msk [vmem:[%s453_s17 + $0x98] sm:$0xff] %vm234_vm0, %v221_v20  ;;  %238 = vst.msk [vmem:[%s453_s17 + $0x18] sm:$0xff] %vm234_vm0, %v189_v21 }
  0x9d   : > { %v222_v22 = vpop.trf.xlu1  ;;  %v190_v23 = vpop.trf.xlu0 }
  0x9e   : > { %255 = vst.msk [vmem:[%s453_s17 + $0xa0] sm:$0xff] %vm234_vm0, %v222_v22  ;;  %239 = vst.msk [vmem:[%s453_s17 + $0x20] sm:$0xff] %vm234_vm0, %v190_v23 }
  0xa1   : > { %v223_v24 = vpop.trf.xlu1  ;;  %v191_v25 = vpop.trf.xlu0 }
  0xa2   : > { %256 = vst.msk [vmem:[%s453_s17 + $0xa8] sm:$0xff] %vm234_vm0, %v223_v24  ;;  %240 = vst.msk [vmem:[%s453_s17 + $0x28] sm:$0xff] %vm234_vm0, %v191_v25 }
  0xa5   : > { %v224_v26 = vpop.trf.xlu1  ;;  %v192_v27 = vpop.trf.xlu0 }
  0xa6   : > { %257 = vst.msk [vmem:[%s453_s17 + $0xb0] sm:$0xff] %vm234_vm0, %v224_v26  ;;  %241 = vst.msk [vmem:[%s453_s17 + $0x30] sm:$0xff] %vm234_vm0, %v192_v27 }
  0xa9   : > { %v225_v28 = vpop.trf.xlu1  ;;  %v193_v29 = vpop.trf.xlu0 }
  0xaa   : > { %258 = vst.msk [vmem:[%s453_s17 + $0xb8] sm:$0xff] %vm234_vm0, %v225_v28  ;;  %242 = vst.msk [vmem:[%s453_s17 + $0x38] sm:$0xff] %vm234_vm0, %v193_v29 }
  0xad   : > { %v226_v30 = vpop.trf.xlu1  ;;  %v194_v31 = vpop.trf.xlu0 }
  0xae   : > { %259 = vst.msk [vmem:[%s453_s17 + $0xc0] sm:$0xff] %vm234_vm0, %v226_v30  ;;  %243 = vst.msk [vmem:[%s453_s17 + $0x40] sm:$0xff] %vm234_vm0, %v194_v31 }
  0xb1   : > { %v227_v32 = vpop.trf.xlu1  ;;  %v195_v33 = vpop.trf.xlu0 }
  0xb2   : > { %260 = vst.msk [vmem:[%s453_s17 + $0xc8] sm:$0xff] %vm234_vm0, %v227_v32  ;;  %244 = vst.msk [vmem:[%s453_s17 + $0x48] sm:$0xff] %vm234_vm0, %v195_v33 }
  0xb5   : > { %v228_v34 = vpop.trf.xlu1  ;;  %v196_v35 = vpop.trf.xlu0 }
  0xb6   : > { %261 = vst.msk [vmem:[%s453_s17 + $0xd0] sm:$0xff] %vm234_vm0, %v228_v34  ;;  %245 = vst.msk [vmem:[%s453_s17 + $0x50] sm:$0xff] %vm234_vm0, %v196_v35 }
  0xb9   : > { %v229_v36 = vpop.trf.xlu1  ;;  %v197_v37 = vpop.trf.xlu0 }
  0xba   : > { %262 = vst.msk [vmem:[%s453_s17 + $0xd8] sm:$0xff] %vm234_vm0, %v229_v36  ;;  %246 = vst.msk [vmem:[%s453_s17 + $0x58] sm:$0xff] %vm234_vm0, %v197_v37 }
  0xbd   : > { %v230_v38 = vpop.trf.xlu1  ;;  %v198_v39 = vpop.trf.xlu0 }
  0xbe   : > { %263 = vst.msk [vmem:[%s453_s17 + $0xe0] sm:$0xff] %vm234_vm0, %v230_v38  ;;  %247 = vst.msk [vmem:[%s453_s17 + $0x60] sm:$0xff] %vm234_vm0, %v198_v39 }
  0xc1   : > { %v231_v40 = vpop.trf.xlu1  ;;  %v199_v41 = vpop.trf.xlu0 }
  0xc2   : > { %264 = vst.msk [vmem:[%s453_s17 + $0xe8] sm:$0xff] %vm234_vm0, %v231_v40  ;;  %248 = vst.msk [vmem:[%s453_s17 + $0x68] sm:$0xff] %vm234_vm0, %v199_v41 }
  0xc5   : > { %v232_v42 = vpop.trf.xlu1  ;;  %v200_v43 = vpop.trf.xlu0 }
  0xc6   : > { %265 = vst.msk [vmem:[%s453_s17 + $0xf0] sm:$0xff] %vm234_vm0, %v232_v42  ;;  %249 = vst.msk [vmem:[%s453_s17 + $0x70] sm:$0xff] %vm234_vm0, %v200_v43 }
  0xc9   : > { %v233_v44 = vpop.trf.xlu1  ;;  %v201_v45 = vpop.trf.xlu0 }
  0xca   : > { %266 = vst.msk [vmem:[%s453_s17 + $0xf8] sm:$0xff] %vm234_vm0, %v233_v44  ;;  %250 = vst.msk [vmem:[%s453_s17 + $0x78] sm:$0xff] %vm234_vm0, %v201_v45 }
  0xcb PF: > { %s11_s8 = sadd.s32 1, %s413_s8   ;;  %s530_s6 = smov %s409_s7 }
  0xcc   : > { %p8_p5 = scmp.ge.s32.totalorder %s11_s8, 4   ;;  %s531_s7 = smov %s533_s9 }
  0xce   :  { %10 = sbr.rel (!%p8_p5) target bundleno = 2 (0x2), region = 54 }

</bundles_post_ra>
